<compile_context>
chip_gen: v7x
topology: tpu7x:2x2x1
jax: 0.10.0
libtpu: 0.0.40
codegen_flags: <defaults>
</compile_context>

<pallas_src>
import functools
import numpy as np
import jax
import jax.numpy as jnp
from jax.experimental import pallas as pl
from jax.experimental.pallas import tpu as pltpu

EPS = 1e-4                      # eps of normalize()
COMPUTE_DTYPE = jnp.bfloat16    # MXU operand dtype (accumulation stays f32)
TILE_MAX = 512                  # max node tile (row & contraction)
XS_RESIDENT_BYTES = 4 << 20     # keep source features resident in VMEM below this


def _round_up(n, m):
    return ((n + m - 1) // m) * m


def _pick_tiles(n):
    """Return (n_pad, tm, tk).

    tk = contraction tile (lane dim of A, multiple of 128); tm = destination
    row tile.  Small graphs: tm is halved so the 'parallel' grid axis has at
    least 2 steps (v7x has 2 TensorCores).  Large graphs: 512x512 tiles keep
    the mem-bound adjacency contraction near the HBM roofline (int8/bf16
    tiles stay far under the default scoped VMEM on all generations).
    """
    n128 = _round_up(max(n, 1), 128)
    if n128 <= TILE_MAX:
        n_pad = n128
        tk = n_pad
        tm = max(64, n_pad // 2)          # >=2 row tiles; multiple of 32 (int8 sublanes)
    else:
        n_pad = _round_up(n, TILE_MAX)
        tm = tk = TILE_MAX
    return n_pad, tm, tk


def _pad_rows(a, rows):
    if a.shape[0] == rows:
        return a
    return jnp.pad(a, [(0, rows - a.shape[0])] + [(0, 0)] * (a.ndim - 1))


def _normalize_w(w, eps=EPS):
    """Row-wise magnitude-preserving normalize() of the reference module."""
    norm = jnp.sqrt(jnp.sum(w * w, axis=1, keepdims=True))
    return w / (eps + norm * (1.0 / np.sqrt(w.shape[1])))


# ------------------------------------------------------------------ kernel --

def _hip_layer_kernel(a_ref, xs_ref, xd_ref, ae_ref, scale_ref,
                      wlx_ref, wle_ref, wr_ref, o_ref, acc_ref,
                      *, tk, xs_resident):
    """One fused MP_HIPGnnConv layer (neighbouring MP_GeoLinear folded in).

    grid = (dst row tiles ["parallel"], src contraction tiles ["arbitrary"])
      acc += A_cnt_tile @ x_src_tile          (raw int8 counts -> bf16 on MXU)
    last contraction step:
      out = (acc * 1/sqrt(deg)) @ wlx + agg_e @ wle + x_dst @ wr
    (mp_cat wa/wb and mp_sum 1/sqrt(2) scales are folded into the weights.)
    """
    k = pl.program_id(1)

    @pl.when(k == 0)
    def _():
        acc_ref[...] = jnp.zeros_like(acc_ref)

    if xs_resident:
        off = pl.multiple_of(k * tk, tk)
        xs = xs_ref[pl.ds(off, tk), :]          # slice resident source features
    else:
        xs = xs_ref[...]

    # A is stored as raw int8 edge counts (row scale applied in the epilogue);
    # widen to bf16 so the MXU path is bf16 x bf16 -> f32 on every TPU gen.
    acc_ref[...] += jnp.dot(a_ref[...].astype(xs.dtype), xs,
                            preferred_element_type=jnp.float32)

    @pl.when(k == pl.num_programs(1) - 1)
    def _():
        agg = (acc_ref[...] * scale_ref[...]).astype(wlx_ref.dtype)
        out = jnp.dot(agg, wlx_ref[...], preferred_element_type=jnp.float32)
        out = out + jnp.dot(ae_ref[...], wle_ref[...],
                            preferred_element_type=jnp.float32)
        out = out + jnp.dot(xd_ref[...], wr_ref[...],
                            preferred_element_type=jnp.float32)
        # TODO(synk): feature dims of 8-32 leave lanes / the store path badly
        # underused; a nodes-on-lanes epilogue layout is the next lever once
        # the adjacency stream is no longer the bottleneck.
        o_ref[...] = out.astype(o_ref.dtype)


def hip_layer(a_cnt, x_pad, agg_e, inv_sqrt_deg, wlx, wle, wr,
              *, out_dtype, tm, tk):
    n_pad, h_in = x_pad.shape
    de = agg_e.shape[1]
    cout = wlx.shape[1]

    xs_resident = n_pad * h_in * x_pad.dtype.itemsize <= XS_RESIDENT_BYTES
    if xs_resident:
        # Whole source-feature matrix stays resident in VMEM (block index is
        # constant across the grid -> fetched once, never re-streamed per i).
        xs_spec = pl.BlockSpec((n_pad, h_in), lambda i, k: (0, 0))
    else:
        xs_spec = pl.BlockSpec((tk, h_in), lambda i, k: (k, 0))

    kernel = functools.partial(_hip_layer_kernel, tk=tk, xs_resident=xs_resident)
    return pl.pallas_call(
        kernel,
        out_shape=jax.ShapeDtypeStruct((n_pad, cout), out_dtype),
        grid=(n_pad // tm, n_pad // tk),
        in_specs=[
            pl.BlockSpec((tm, tk), lambda i, k: (i, k)),      # A counts (int8)
            xs_spec,                                          # x (source rows)
            pl.BlockSpec((tm, h_in), lambda i, k: (i, 0)),    # x (dest rows, lin_r)
            pl.BlockSpec((tm, de), lambda i, k: (i, 0)),      # edge aggregation
            pl.BlockSpec((tm, 1), lambda i, k: (i, 0)),       # 1/sqrt(deg)
            pl.BlockSpec((h_in, cout), lambda i, k: (0, 0)),  # folded lin_l (x part)
            pl.BlockSpec((de, cout), lambda i, k: (0, 0)),    # folded lin_l (edge part)
            pl.BlockSpec((h_in, cout), lambda i, k: (0, 0)),  # folded lin_r
        ],
        out_specs=pl.BlockSpec((tm, cout), lambda i, k: (i, 0)),
        scratch_shapes=[pltpu.VMEM((tm, h_in), jnp.float32)],
        compiler_params=pltpu.CompilerParams(
            dimension_semantics=("parallel", "arbitrary")),
    )(a_cnt, x_pad, x_pad, agg_e, inv_sqrt_deg, wlx, wle, wr)


# ------------------------------------------------------- precompute (glue) --

def prepare_graph(edge_index, edge_attr, n):
    """Graph-dependent precompute.  A and deg are static per graph (cache
    across forwards in real use); agg_e additionally depends on edge_attr."""
    n_pad, _, _ = _pick_tiles(n)
    src, dst = edge_index[0], edge_index[1]
    de = edge_attr.shape[1]

    deg = jnp.maximum(jnp.zeros((n_pad,), jnp.float32).at[dst].add(1.0), 1.0)
    inv_sqrt_deg = (1.0 / jnp.sqrt(deg))[:, None]                   # (n_pad, 1) f32

    # Raw edge multiplicities, int8 (exact small integers, 1 byte/entry).
    a_cnt = jnp.zeros((n_pad, n_pad), jnp.float32).at[dst, src].add(1.0)
    a_cnt = a_cnt.astype(jnp.int8)

    # Degree-normalized destination aggregation of edge attributes
    # (layer-invariant; the mp_cat wb scale is folded into the weights).
    agg_e = jnp.zeros((n_pad, de), jnp.float32).at[dst].add(edge_attr)
    agg_e = (agg_e * inv_sqrt_deg).astype(COMPUTE_DTYPE)
    return a_cnt, inv_sqrt_deg, agg_e


def prepare_weights(params, de):
    """Fold MP_GeoLinear weight-norm, mp_cat (wa, wb) and mp_sum (1/sqrt(2))
    scales, and the first/last MP_GeoLinear (w0 / w3) into the two conv
    layers' weights.  Valid because heterogenous_mp_silu / apply_scaling are
    identity for plain tensors, so the whole forward is linear."""
    hid = params["w0"].shape[0]
    t = 0.5
    C = np.sqrt((hid + de) / ((1 - t) ** 2 + t ** 2))
    wa = float(C / np.sqrt(hid) * (1 - t))
    wb = float(C / np.sqrt(de) * t)
    s = float(1.0 / np.sqrt(2.0))

    def geo(w):  # normalize(w) * 1/sqrt(fan_in), transposed to (in, out)
        return jnp.transpose(_normalize_w(w) * (1.0 / np.sqrt(w.shape[1])))

    w0_t = geo(params["w0"])                      # (F_IN, HID)
    w3_t = geo(params["w3"])                      # (HID, OUT)
    wl1 = geo(params["wl1"])                      # (HID+DE, HID)
    wr1 = geo(params["wr1"])                      # (HID, HID)
    wl2 = geo(params["wl2"])                      # (HID+DE, HID)
    wr2 = geo(params["wr2"])                      # (HID, HID)

    layer1 = ((w0_t @ wl1[:hid]) * (wa * s),      # (F_IN, HID)  agg_x path (w0 folded)
              wl1[hid:] * (wb * s),               # (DE,  HID)   agg_e path
              (w0_t @ wr1) * s)                   # (F_IN, HID)  lin_r path (w0 folded)
    layer2 = ((wl2[:hid] @ w3_t) * (wa * s),      # (HID, OUT)   agg_x path (w3 folded)
              (wl2[hid:] @ w3_t) * (wb * s),      # (DE,  OUT)
              (wr2 @ w3_t) * s)                   # (HID, OUT)
    cast = lambda ws: tuple(w.astype(COMPUTE_DTYPE) for w in ws)
    return cast(layer1), cast(layer2)


# ------------------------------------------------------------- full forward --

def mp_gnn_forward(params, x, edge_index, edge_attr, graph=None):
    n = x.shape[0]
    de = edge_attr.shape[1]
    n_pad, tm, tk = _pick_tiles(n)
    if graph is None:
        graph = prepare_graph(edge_index, edge_attr, n)
    a_cnt, inv_sqrt_deg, agg_e = graph
    l1, l2 = prepare_weights(params, de)

    x_pad = _pad_rows(x, n_pad).astype(COMPUTE_DTYPE)
    # Layer 1 (MP_GeoLinear(-1, hidden) folded in; contraction width = F_IN).
    h = hip_layer(a_cnt, x_pad, agg_e, inv_sqrt_deg, *l1,
                  out_dtype=COMPUTE_DTYPE, tm=tm, tk=tk)
    # Layer 2 (MP_GeoLinear(-1, out) folded in; final output in f32).
    out = hip_layer(a_cnt, h, agg_e, inv_sqrt_deg, *l2,
                    out_dtype=jnp.float32, tm=tm, tk=tk)
    return out[:n]


# ------------------------------------------------------------ pure-JAX reference

def _geo_linear_ref(x, w, gain=1.0):
    wn = _normalize_w(w) * (gain / np.sqrt(w.shape[1]))
    return x @ wn.T


def _hip_conv_ref(x, src, dst, edge_attr, wl, wr, n):
    h, de = x.shape[1], edge_attr.shape[1]
    t = 0.5
    C = np.sqrt((h + de) / ((1 - t) ** 2 + t ** 2))
    wa = C / np.sqrt(h) * (1 - t)
    wb = C / np.sqrt(de) * t
    msg = jnp.concatenate([wa * x[src], wb * edge_attr], axis=1)
    agg = jnp.zeros((n, msg.shape[1]), jnp.float32).at[dst].add(msg)
    deg = jnp.maximum(jnp.zeros((n,), jnp.float32).at[dst].add(1.0), 1.0)
    agg = agg / jnp.sqrt(deg)[:, None]
    return (_geo_linear_ref(agg, wl) + _geo_linear_ref(x, wr)) / np.sqrt(2.0)


def mp_gnn_ref(params, x, edge_index, edge_attr):
    n = x.shape[0]
    src, dst = edge_index[0], edge_index[1]
    h = _geo_linear_ref(x, params["w0"])
    for wl, wr in ((params["wl1"], params["wr1"]),
                   (params["wl2"], params["wr2"])):
        h = _hip_conv_ref(h, src, dst, edge_attr, wl, wr, n)
    return _geo_linear_ref(h, params["w3"])


# ------------------------------------------------------------------------ main

if __name__ == "__main__":
    N, E = 32, 64            # nodes, edges
    F_IN, HIDDEN, OUT, EDGE_DIM = 16, 32, 16, 8

    key = jax.random.PRNGKey(0)
    ks = jax.random.split(key, 10)
    x = jax.random.normal(ks[0], (N, F_IN), dtype=jnp.float32)
    src = jax.random.randint(ks[1], (E,), 0, N)
    dst = jax.random.randint(ks[2], (E,), 0, N)
    edge_index = jnp.stack([src, dst]).astype(jnp.int32)
    edge_attr = jax.random.normal(ks[3], (E, EDGE_DIM), dtype=jnp.float32)

    # Deterministic std-normal weights (torch.nn.init._no_grad_normal_(w, 0, 1)).
    # Lazy (-1) in_channels resolve to: F_IN, HIDDEN+EDGE_DIM (lin_l), HIDDEN (lin_r), HIDDEN.
    params = {
        "w0":  jax.random.normal(ks[4], (HIDDEN, F_IN), dtype=jnp.float32),
        "wl1": jax.random.normal(ks[5], (HIDDEN, HIDDEN + EDGE_DIM), dtype=jnp.float32),
        "wr1": jax.random.normal(ks[6], (HIDDEN, HIDDEN), dtype=jnp.float32),
        "wl2": jax.random.normal(ks[7], (HIDDEN, HIDDEN + EDGE_DIM), dtype=jnp.float32),
        "wr2": jax.random.normal(ks[8], (HIDDEN, HIDDEN), dtype=jnp.float32),
        "w3":  jax.random.normal(ks[9], (OUT, HIDDEN), dtype=jnp.float32),
    }

    # Graph precompute hoisted out of the forward (static per graph).
    graph = prepare_graph(edge_index, edge_attr, N)
    out = mp_gnn_forward(params, x, edge_index, edge_attr, graph=graph)
    out = jax.block_until_ready(out)

    ref = jax.block_until_ready(mp_gnn_ref(params, x, edge_index, edge_attr))
    # Tolerance reflects bf16 MXU operands (f32 accumulation) vs a pure-f32
    # reference; the int8 adjacency counts themselves are exact.
    np.testing.assert_allclose(np.asarray(out), np.asarray(ref),
                               rtol=2e-2, atol=2e-2)

    print("KERNEL_OK")
</pallas_src>

<mosaic_0001>
module attributes {stable_mosaic.version = 11 : i64} {
  func.func @_hip_layer_kernel(%arg0: i32, %arg1: i32, %arg2: memref<64x128xi8, #tpu.memory_space<vmem>>, %arg3: memref<128x16xbf16, #tpu.memory_space<vmem>>, %arg4: memref<64x16xbf16, #tpu.memory_space<vmem>>, %arg5: memref<64x8xbf16, #tpu.memory_space<vmem>>, %arg6: memref<64x1xf32, #tpu.memory_space<vmem>>, %arg7: memref<16x32xbf16, #tpu.memory_space<vmem>>, %arg8: memref<8x32xbf16, #tpu.memory_space<vmem>>, %arg9: memref<16x32xbf16, #tpu.memory_space<vmem>>, %arg10: memref<64x32xbf16, #tpu.memory_space<vmem>>, %arg11: memref<64x16xf32, #tpu.memory_space<vmem>>) attributes {dimension_semantics = [#tpu.dimension_semantics<parallel>, #tpu.dimension_semantics<arbitrary>], iteration_bounds = array<i64: 2, 1>, scalar_prefetch = 0 : i64, scratch_operands = 1 : i64, tpu.core_type = #tpu.core_type<tc>, window_params = [{transform_indices = @transform_0, window_bounds = array<i64: 64, 128>}, {pipeline_mode = #tpu.pipeline_mode<synchronous>, transform_indices = @transform_1, window_bounds = array<i64: 128, 16>}, {transform_indices = @transform_2, window_bounds = array<i64: 64, 16>}, {transform_indices = @transform_3, window_bounds = array<i64: 64, 8>}, {transform_indices = @transform_4, window_bounds = array<i64: 64, 1>}, {pipeline_mode = #tpu.pipeline_mode<synchronous>, transform_indices = @transform_5, window_bounds = array<i64: 16, 32>}, {pipeline_mode = #tpu.pipeline_mode<synchronous>, transform_indices = @transform_6, window_bounds = array<i64: 8, 32>}, {pipeline_mode = #tpu.pipeline_mode<synchronous>, transform_indices = @transform_7, window_bounds = array<i64: 16, 32>}, {transform_indices = @transform_8, window_bounds = array<i64: 64, 32>}]} {
    %c0_i32 = arith.constant 0 : i32
    %0 = arith.cmpi eq, %arg1, %c0_i32 : i32
    %1 = arith.extui %0 : i1 to i32
    %c0_i32_0 = arith.constant 0 : i32
    %2 = arith.cmpi ne, %1, %c0_i32_0 : i32
    scf.if %2 {
      %cst_9 = arith.constant 0.000000e+00 : f32
      %16 = vector.broadcast %cst_9 : f32 to vector<64x16xf32>
      %c0_10 = arith.constant 0 : index
      %c0_11 = arith.constant 0 : index
      %17 = vector.load %arg11[%c0_10, %c0_11] : memref<64x16xf32, #tpu.memory_space<vmem>>, vector<64x16xf32>
      tpu.vector_store %arg11[%c0_10, %c0_11], %16 {strides = array<i32>} : memref<64x16xf32, #tpu.memory_space<vmem>>, vector<64x16xf32>,
    } else {
    }
    %c128_i32 = arith.constant 128 : i32
    %3 = arith.muli %arg1, %c128_i32 : i32
    %4 = tpu.assume_multiple %3, 128 : i32
    %5 = arith.index_cast %4 : i32 to index
    %c0 = arith.constant 0 : index
    %6 = vector.load %arg3[%5, %c0] : memref<128x16xbf16, #tpu.memory_space<vmem>>, vector<128x16xbf16>
    %c0_1 = arith.constant 0 : index
    %c0_2 = arith.constant 0 : index
    %7 = vector.load %arg11[%c0_1, %c0_2] : memref<64x16xf32, #tpu.memory_space<vmem>>, vector<64x16xf32>
    %c0_3 = arith.constant 0 : index
    %c0_4 = arith.constant 0 : index
    %8 = vector.load %arg2[%c0_3, %c0_4] : memref<64x128xi8, #tpu.memory_space<vmem>>, vector<64x128xi8>
    %9 = arith.sitofp %8 : vector<64x128xi8> to vector<64x128xbf16>
    %cst = arith.constant dense<0.000000e+00> : vector<64x16xf32>
    %10 = tpu.matmul %9, %6, %cst {dimension_numbers = #tpu.dot_dimension_numbers<[1], [0], [0], [1], [0, 0, 1, 1], [], []>} : vector<64x128xbf16>, vector<128x16xbf16>, vector<64x16xf32> -> vector<64x16xf32>
    %11 = arith.addf %7, %10 : vector<64x16xf32>
    %c0_5 = arith.constant 0 : index
    %c0_6 = arith.constant 0 : index
    %12 = vector.load %arg11[%c0_5, %c0_6] : memref<64x16xf32, #tpu.memory_space<vmem>>, vector<64x16xf32>
    tpu.vector_store %arg11[%c0_5, %c0_6], %11 {strides = array<i32>} : memref<64x16xf32, #tpu.memory_space<vmem>>, vector<64x16xf32>,
    %c0_i32_7 = arith.constant 0 : i32
    %13 = arith.cmpi eq, %arg1, %c0_i32_7 : i32
    %14 = arith.extui %13 : i1 to i32
    %c0_i32_8 = arith.constant 0 : i32
    %15 = arith.cmpi ne, %14, %c0_i32_8 : i32
    scf.if %15 {
      %c0_9 = arith.constant 0 : index
      %c0_10 = arith.constant 0 : index
      %16 = vector.load %arg11[%c0_9, %c0_10] : memref<64x16xf32, #tpu.memory_space<vmem>>, vector<64x16xf32>
      %c0_11 = arith.constant 0 : index
      %c0_12 = arith.constant 0 : index
      %17 = vector.load %arg6[%c0_11, %c0_12] : memref<64x1xf32, #tpu.memory_space<vmem>>, vector<64x1xf32>
      %18 = vector.broadcast %17 : vector<64x1xf32> to vector<64x16xf32>
      %19 = arith.mulf %16, %18 : vector<64x16xf32>
      %20 = arith.truncf %19 : vector<64x16xf32> to vector<64x16xbf16>
      %c0_13 = arith.constant 0 : index
      %c0_14 = arith.constant 0 : index
      %21 = vector.load %arg7[%c0_13, %c0_14] : memref<16x32xbf16, #tpu.memory_space<vmem>>, vector<16x32xbf16>
      %cst_15 = arith.constant dense<0.000000e+00> : vector<64x32xf32>
      %22 = tpu.matmul %20, %21, %cst_15 {dimension_numbers = #tpu.dot_dimension_numbers<[1], [0], [0], [1], [0, 0, 1, 1], [], []>} : vector<64x16xbf16>, vector<16x32xbf16>, vector<64x32xf32> -> vector<64x32xf32>
      %c0_16 = arith.constant 0 : index
      %c0_17 = arith.constant 0 : index
      %23 = vector.load %arg5[%c0_16, %c0_17] : memref<64x8xbf16, #tpu.memory_space<vmem>>, vector<64x8xbf16>
      %c0_18 = arith.constant 0 : index
      %c0_19 = arith.constant 0 : index
      %24 = vector.load %arg8[%c0_18, %c0_19] : memref<8x32xbf16, #tpu.memory_space<vmem>>, vector<8x32xbf16>
      %cst_20 = arith.constant dense<0.000000e+00> : vector<64x32xf32>
      %25 = tpu.matmul %23, %24, %cst_20 {dimension_numbers = #tpu.dot_dimension_numbers<[1], [0], [0], [1], [0, 0, 1, 1], [], []>} : vector<64x8xbf16>, vector<8x32xbf16>, vector<64x32xf32> -> vector<64x32xf32>
      %26 = arith.addf %22, %25 : vector<64x32xf32>
      %c0_21 = arith.constant 0 : index
      %c0_22 = arith.constant 0 : index
      %27 = vector.load %arg4[%c0_21, %c0_22] : memref<64x16xbf16, #tpu.memory_space<vmem>>, vector<64x16xbf16>
      %c0_23 = arith.constant 0 : index
      %c0_24 = arith.constant 0 : index
      %28 = vector.load %arg9[%c0_23, %c0_24] : memref<16x32xbf16, #tpu.memory_space<vmem>>, vector<16x32xbf16>
      %cst_25 = arith.constant dense<0.000000e+00> : vector<64x32xf32>
      %29 = tpu.matmul %27, %28, %cst_25 {dimension_numbers = #tpu.dot_dimension_numbers<[1], [0], [0], [1], [0, 0, 1, 1], [], []>} : vector<64x16xbf16>, vector<16x32xbf16>, vector<64x32xf32> -> vector<64x32xf32>
      %30 = arith.addf %26, %29 : vector<64x32xf32>
      %31 = arith.truncf %30 : vector<64x32xf32> to vector<64x32xbf16>
      %c0_26 = arith.constant 0 : index
      %c0_27 = arith.constant 0 : index
      %32 = vector.load %arg10[%c0_26, %c0_27] : memref<64x32xbf16, #tpu.memory_space<vmem>>, vector<64x32xbf16>
      tpu.vector_store %arg10[%c0_26, %c0_27], %31 {strides = array<i32>} : memref<64x32xbf16, #tpu.memory_space<vmem>>, vector<64x32xbf16>,
    } else {
    }
    return
  }
  func.func @transform_0(%arg0: i32, %arg1: i32) -> (i32, i32) {
    %c0_i32 = arith.constant 0 : i32
    return %arg0, %arg1 : i32, i32
  }
  func.func @transform_1(%arg0: i32, %arg1: i32) -> (i32, i32) {
    %c0_i32 = arith.constant 0 : i32
    %c0_i32_0 = arith.constant 0 : i32
    %c0_i32_1 = arith.constant 0 : i32
    return %c0_i32, %c0_i32_0 : i32, i32
  }
  func.func @transform_2(%arg0: i32, %arg1: i32) -> (i32, i32) {
    %c0_i32 = arith.constant 0 : i32
    %c0_i32_0 = arith.constant 0 : i32
    return %arg0, %c0_i32 : i32, i32
  }
  func.func @transform_3(%arg0: i32, %arg1: i32) -> (i32, i32) {
    %c0_i32 = arith.constant 0 : i32
    %c0_i32_0 = arith.constant 0 : i32
    return %arg0, %c0_i32 : i32, i32
  }
  func.func @transform_4(%arg0: i32, %arg1: i32) -> (i32, i32) {
    %c0_i32 = arith.constant 0 : i32
    %c0_i32_0 = arith.constant 0 : i32
    return %arg0, %c0_i32 : i32, i32
  }
  func.func @transform_5(%arg0: i32, %arg1: i32) -> (i32, i32) {
    %c0_i32 = arith.constant 0 : i32
    %c0_i32_0 = arith.constant 0 : i32
    %c0_i32_1 = arith.constant 0 : i32
    return %c0_i32, %c0_i32_0 : i32, i32
  }
  func.func @transform_6(%arg0: i32, %arg1: i32) -> (i32, i32) {
    %c0_i32 = arith.constant 0 : i32
    %c0_i32_0 = arith.constant 0 : i32
    %c0_i32_1 = arith.constant 0 : i32
    return %c0_i32, %c0_i32_0 : i32, i32
  }
  func.func @transform_7(%arg0: i32, %arg1: i32) -> (i32, i32) {
    %c0_i32 = arith.constant 0 : i32
    %c0_i32_0 = arith.constant 0 : i32
    %c0_i32_1 = arith.constant 0 : i32
    return %c0_i32, %c0_i32_0 : i32, i32
  }
  func.func @transform_8(%arg0: i32, %arg1: i32) -> (i32, i32) {
    %c0_i32 = arith.constant 0 : i32
    %c0_i32_0 = arith.constant 0 : i32
    return %arg0, %c0_i32 : i32, i32
  }
}

</mosaic_0001>

<bundles_post_ra>
// kernel: tpu_custom_call.1
= control target key start
LH: loop header
LB: loop body
LE: loop exit
PB: predicated region body
PF: predicated region fallthrough
CT: control target
= control target key end

     0   :  { %s1390_s27 = smov 0   ;;  %s1392_s28 = smov 0   ;;  %s1532_s0 = inlined_call_operand.vmem [shape: s8[128,128], index: 0, kind: input, shape index: {}]   ;;  %s1533_s1 = inlined_call_operand.vmem [shape: bf16[128,16], index: 1, kind: input, shape index: {}]   ;;  %s1534_s2 = inlined_call_operand.vmem [shape: bf16[128,16], index: 2, kind: input, shape index: {}]   ;;  %s1535_s3 = inlined_call_operand.vmem [shape: bf16[128,8], index: 3, kind: input, shape index: {}]   ;;  %s1536_s4 = inlined_call_operand.vmem [shape: f32[128,1], index: 4, kind: input, shape index: {}]   ;;  %s1537_s5 = inlined_call_operand.vmem [shape: bf16[16,32], index: 5, kind: input, shape index: {}]   ;;  %s1538_s6 = inlined_call_operand.vmem [shape: bf16[8,32], index: 6, kind: input, shape index: {}]   ;;  %s1539_s7 = inlined_call_operand.vmem [shape: bf16[16,32], index: 7, kind: input, shape index: {}]   ;;  %s1540_s8 = inlined_call_operand.vmem [shape: bf16[128,32], index: 8, kind: output, shape index: {}]  }
   0x1   :  { %s1394_s29 = smov 0  }
   0x2 LB: > { %s30_s30 = sadd.s32 1, %s1337_s28  ;;  %p1116_p0 = scmp.ge.s32.totalorder %s1341_s29, 1  ;;  %s1341_s29 = sphi %s1394_s29, %s18_s29   ;;  %s1337_s28 = sphi %s1392_s28, %s1542_s28   ;;  %s1333_s27 = sphi %s1390_s27, %s1541_s27  }
   0x3   : > { %p32_p1 = scmp.ge.s32.totalorder %s30_s30, 2  ;;  %p313_p2 = scmp.lt.s32.totalorder %s1341_s29, 3 }
   0x5   : > { %s1544_s30 = smov (%p32_p1, %s30_s30), 0  ;;  %p314_p3 = pnand %p1116_p0, %p313_p2 }
   0x6   : > { %v1301_v0 = vld [vmem:[%s1533_s1] sm:$0xff] (!%p314_p3)   ;;  %s1117_s11 = sshll.u32 (!%p314_p3), %s1333_s27, 1  ;;  %v1302_v1 = vld [vmem:[%s1533_s1 + $0x8] sm:$0xff] (!%p314_p3)   ;;  %v1343_v2 = vmov (!%p314_p3), 0   ;;  %v1303_v3 = vld [vmem:[%s1533_s1 + $0x10] sm:$0xff] (!%p314_p3)   ;;  %s1119_s16 = sshll.u32 (!%p314_p3), %s1333_s27, 3 }
   0x7   : > { %317 = sbr.rel (%p314_p3) target bundleno = 511 (0x1ff), region = 52  ;;  %p366_p4 = scmp.lt.s32.totalorder (!%p314_p3), %s1117_s11, 3  ;;  %1202 = vmatprep.subr.bf16.mxu0 (!%p314_p3), %v1301_v0  ;;  %1299 = vset.pattern.permute.xlu0 (!%p314_p3), %v1343_v2  ;;  %v1304_v4 = vld [vmem:[%s1533_s1 + $0x18] sm:$0xff] (!%p314_p3)   ;;  %v1305_v7 = vld [vmem:[%s1533_s1 + $0x20] sm:$0xff] (!%p314_p3)   ;;  %vm692_vm0 = vcmask (!%p314_p3), 1043456   ;;  %vm403_vm1 = vcmask (!%p314_p3), 130048  }
   0x8   : > { %1203 = vmatpush3.bf16.msra.mxu0 (!%p314_p3), %v1301_v0  ;;  %1300 = vset.pattern.permute.xlu1 (!%p314_p3), %v1343_v2  ;;  %p375_p5 = scmp.lt.s32.totalorder (!%p314_p3), %s1119_s16, 15  ;;  %v1344_v10 = vmov (!%p314_p3), 0.0   ;;  %v658_v13 = vld [vmem:[%s1538_s6] sm:$0xf] (!%p314_p3)  ;;  %v1306_v15 = vld [vmem:[%s1533_s1 + $0x28] sm:$0xff] (!%p314_p3)   ;;  %v1307_v18 = vld [vmem:[%s1533_s1 + $0x30] sm:$0xff] (!%p314_p3)  }
   0x9   : > { %1204 = vmatprep.subr.bf16.mxu0 (!%p314_p3), %v1302_v1  ;;  %406 = vst.msk [vmem:[#allocation2 + $0x10] sm:$0xff] (!%p314_p3), %vm403_vm1, %v1344_v10  ;;  %404 = vst.msk [vmem:[#allocation2] sm:$0xff] (!%p314_p3), %vm403_vm1, %v1344_v10  ;;  %1272 = vmatprep.subr.msk.bf16.mxu1 (!%p314_p3), %vm692_vm0, %v658_v13  ;;  %v694_v14 = vsel (!%p314_p3), %vm692_vm0, %v658_v13, 0  ;;  %v1308_v21 = vld [vmem:[%s1533_s1 + $0x38] sm:$0xff] (!%p314_p3)   ;;  %vm679_vm2 = vcmask (!%p314_p3), 64512   ;;  %v1309_v28 = vld [vmem:[%s1537_s5] sm:$0xff] (!%p314_p3)  }
   0xa   : > { %405 = vst.msk [vmem:[#allocation2 + $0x8] sm:$0xff] (!%p314_p3), %vm403_vm1, %v1344_v10  ;;  %407 = vst.msk [vmem:[#allocation2 + $0x18] sm:$0xff] (!%p314_p3), %vm403_vm1, %v1344_v10  ;;  %1227 = vmatpush3.bf16.msra.mxu1 (!%p314_p3), %v694_v14  ;;  %v1314_v31 = vld [vmem:[%s1539_s7] sm:$0xff] (!%p314_p3)   ;;  %vm997_vm3 = vcmask (!%p314_p3), 257024  }
   0xb   : > { %408 = vst.msk [vmem:[#allocation2 + $0x20] sm:$0xff] (!%p314_p3), %vm403_vm1, %v1344_v10  ;;  %409 = vst.msk [vmem:[#allocation2 + $0x28] sm:$0xff] (!%p314_p3), %vm403_vm1, %v1344_v10  ;;  %1236 = vmatprep.subr.bf16.mxu1 (!%p314_p3), %v1309_v28 }
   0xc   : > { %1205 = vmatpush3.bf16.msra.mxu0 (!%p314_p3), %v1302_v1  ;;  %410 = vst.msk [vmem:[#allocation2 + $0x30] sm:$0xff] (!%p314_p3), %vm403_vm1, %v1344_v10  ;;  %411 = vst.msk [vmem:[#allocation2 + $0x38] sm:$0xff] (!%p314_p3), %vm403_vm1, %v1344_v10 }
   0xd   : > { %1206 = vmatprep.subr.bf16.mxu0 (!%p314_p3), %v1303_v3 }
   0xe   : > { %s1546_s11 = smov (!%p366_p4, %s1117_s11), 3  ;;  %s1548_s16 = smov (!%p375_p5, %s1119_s16), 15 }
   0xf   : > { %s1118_s17 = sshll.u32 %s1546_s11, 3  ;;  %s1124_s23 = sshll.u32 %s1548_s16, 3 }
  0x10   : > { %s1424_s20 = scalar_lea.vmem %s1532_s0, %s1118_s17  ;;  %1207 = vmatpush3.bf16.msra.mxu0 %v1303_v3  ;;  %s1436_s26 = scalar_lea.vmem %s1536_s4, %s1124_s23  ;;  %v435_v32 = vld [vmem:[#allocation2 + $0x10] sm:$0xff]  ;;  %v433_v33 = vld [vmem:[#allocation2] sm:$0xff] }
  0x11   : > { %v441_v5 = vld [vmem:[%s1424_s20] sm:$0xff]  ;;  %1208 = vmatprep.subr.bf16.mxu0 %v1304_v4  ;;  %v590_v9 = vld [vmem:[%s1436_s26 + $0x10] sm:$0xff]  ;;  %v589_v11 = vld [vmem:[%s1436_s26 + $0x8] sm:$0xff]  ;;  %s1473_s19 = sshll.u32 %s1548_s16, 2 }
  0x12   : > { %v443_v6 = vunpack.c.l.s8.bf16 %v441_v5  ;;  %v588_v8 = vld [vmem:[%s1436_s26] sm:$0xff]  ;;  %608 = vperm.xlu1 %1300, %v590_v9   ;;  %v591_v12 = vld [vmem:[%s1436_s26 + $0x18] sm:$0xff]  ;;  %v593_v17 = vld [vmem:[%s1436_s26 + $0x28] sm:$0xff]  ;;  %v444_v23 = vunpack.c.h.s8.bf16 %v441_v5  ;;  %s384_s23 = scalar_lea.vmem %s1535_s3, %s1473_s19  ;;  %s1486_s16 = scalar_lea.vmem %s1534_s2, %s1473_s19 }
  0x13   : > { %598 = vperm.xlu0 %1299, %v588_v8   ;;  %v592_v16 = vld [vmem:[%s1436_s26 + $0x20] sm:$0xff]  ;;  %v594_v19 = vld [vmem:[%s1436_s26 + $0x30] sm:$0xff]  ;;  %v595_v20 = vld [vmem:[%s1436_s26 + $0x38] sm:$0xff]  ;;  %s396_s12 = scalar_lea.vmem %s1540_s8, %s1473_s19 }
  0x14   : > { %1218 = vmatprep.mubr.bf16.mxu0 %v443_v6  ;;  %1209 = vmatpush3.bf16.msra.mxu0 %v1304_v4  ;;  %v442_v22 = vld [vmem:[%s1424_s20 + $0x8] sm:$0xff]  ;;  %v1310_v26 = vld [vmem:[%s384_s23] sm:$0xff]   ;;  %v1312_v29 = vld [vmem:[%s384_s23 + $0x10] sm:$0xff]  }
  0x15   : > { %1210 = vmatprep.subr.bf16.mxu0 %v1305_v7  ;;  %v445_v24 = vunpack.c.l.s8.bf16 %v442_v22  ;;  %v446_v25 = vunpack.c.h.s8.bf16 %v442_v22  ;;  %1228 = vmatprep.mubr.msk.bf16.mxu1 %vm679_vm2, %v1310_v26  ;;  %v1311_v27 = vld [vmem:[%s384_s23 + $0x8] sm:$0xff]   ;;  %v1313_v30 = vld [vmem:[%s384_s23 + $0x18] sm:$0xff]   ;;  %v439_v46 = vld [vmem:[#allocation2 + $0x30] sm:$0xff] }
  0x16   : > { %613 = vperm.xlu1 %1300, %v591_v12   ;;  %1229 = vmatmul.mubr.msk.bf16.vlgmr.msra.gmra.mrb[0].mxu1 %vm679_vm2, %v1311_v27  ;;  %v436_v35 = vld [vmem:[#allocation2 + $0x18] sm:$0xff]  ;;  %v434_v38 = vld [vmem:[#allocation2 + $0x8] sm:$0xff]  ;;  %v437_v47 = vld [vmem:[#allocation2 + $0x20] sm:$0xff] }
  0x17   : > { %603 = vperm.xlu0 %1299, %v589_v11   ;;  %1237 = vmatpush3.bf16.msra.mxu1 %v1309_v28  ;;  %v440_v50 = vld [vmem:[#allocation2 + $0x38] sm:$0xff]  ;;  %v438_v53 = vld [vmem:[#allocation2 + $0x28] sm:$0xff]  ;;  %v1317_v22 = vld [vmem:[%s1486_s16 + $0x10] sm:$0xff]  }
  0x18   : > { %1211 = vmatpush3.bf16.msra.mxu0 %v1305_v7  ;;  %1232 = vmatprep.mubr.msk.bf16.mxu1 %vm679_vm2, %v1312_v29 }
  0x19   : > { %1212 = vmatprep.subr.bf16.mxu0 %v1306_v15  ;;  %1246 = vmatprep.subr.bf16.mxu1 %v1314_v31 }
  0x1a   : > { %623 = vperm.xlu1 %1300, %v593_v17  }
  0x1b   : > { %618 = vperm.xlu0 %1299, %v592_v16  }
  0x1c   : > { %1213 = vmatpush3.bf16.msra.mxu0 %v1306_v15 }
  0x1d   : > { %1214 = vmatprep.subr.bf16.mxu0 %v1307_v18 }
  0x1e   : > { %633 = vperm.xlu1 %1300, %v595_v20   ;;  %1233 = vmatmul.mubr.msk.bf16.gmra.mrb[4].mxu1 %vm679_vm2, %v1313_v30 }
  0x1f   : > { %628 = vperm.xlu0 %1299, %v594_v19   ;;  %v1315_v19 = vld [vmem:[%s1486_s16] sm:$0xff]  }
  0x20   : > { %1215 = vmatpush3.bf16.msra.mxu0 %v1307_v18 }
  0x21   : > { %1216 = vmatprep.subr.bf16.mxu0 %v1308_v21 }
  0x24   : > { %1217 = vmatpush3.bf16.msra.mxu0 %v1308_v21  ;;  %v1316_v21 = vld [vmem:[%s1486_s16 + $0x8] sm:$0xff]  }
  0x27   : > { %1219 = vmatmul.mubr.bf16.vlgmr.msra.gmra.mrb[0].mxu0 %v444_v23  ;;  %v1318_v23 = vld [vmem:[%s1486_s16 + $0x18] sm:$0xff]  }
  0x28   : > { %1222 = vmatprep.mubr.bf16.mxu0 %v445_v24 }
  0x2f   : > { %1223 = vmatmul.mubr.bf16.gmra.mrb[4].mxu0 %v446_v25 }
  0x91   : > { %v609_v39 = vpop.permute.xlu1 %608 }
  0x92   : > { %v599_v44 = vpop.permute.xlu0 %598 }
  0x95   : > { %v614_v48 = vpop.permute.xlu1 %613 }
  0x96   : > { %v604_v54 = vpop.permute.xlu0 %603 }
  0x99   : > { %v624_v1 = vpop.permute.xlu1 %623 }
  0x9a   : > { %v619_v5 = vpop.permute.xlu0 %618 }
  0x9d   : > { %v634_v10 = vpop.permute.xlu1 %633 }
  0x9e   : > { %v629_v14 = vpop.permute.xlu0 %628 }
  0xfa   : > { %v1220_v34 = vpop.f32.mrb[0].mxu0 }
  0xfb   : > { %v562_v36 = vadd.f32 %v1220_v34, %v435_v32  ;;  %v529_v37 = vpop.f32.mrb[1].mxu0 }
  0xfc   : > { %v560_v40 = vadd.f32 %v529_v37, %v433_v33  ;;  %v1221_v41 = vpop.f32.mrb[2].mxu0 }
  0xfd   : > { %571 = vst.msk [vmem:[#allocation2 + $0x10] sm:$0xff] %vm403_vm1, %v562_v36  ;;  %v563_v42 = vadd.f32 %v1221_v41, %v436_v35  ;;  %v532_v43 = vpop.f32.mrb[3].mxu0 }
  0xfe   : > { %569 = vst.msk [vmem:[#allocation2] sm:$0xff] %vm403_vm1, %v560_v40  ;;  %v561_v45 = vadd.f32 %v532_v43, %v434_v38 }
  0xff   : > { %572 = vst.msk [vmem:[#allocation2 + $0x18] sm:$0xff] %vm403_vm1, %v563_v42 }
 0x100   : > { %570 = vst.msk [vmem:[#allocation2 + $0x8] sm:$0xff] %vm403_vm1, %v561_v45 }
 0x102   : > { %v1224_v49 = vpop.f32.mrb[4].mxu0 }
 0x103   : > { %v566_v51 = vadd.f32 %v1224_v49, %v439_v46  ;;  %v545_v52 = vpop.f32.mrb[5].mxu0 }
 0x104   : > { %v564_v55 = vadd.f32 %v545_v52, %v437_v47  ;;  %v1225_v56 = vpop.f32.mrb[6].mxu0  ;;  %v582_v61 = vld [vmem:[#allocation2 + $0x10] sm:$0xff] }
 0x105   : > { %575 = vst.msk [vmem:[#allocation2 + $0x30] sm:$0xff] %vm403_vm1, %v566_v51  ;;  %v567_v57 = vadd.f32 %v1225_v56, %v440_v50  ;;  %v548_v58 = vpop.f32.mrb[7].mxu0  ;;  %v580_v59 = vld [vmem:[#allocation2] sm:$0xff]  ;;  %v638_v4 = vmul.f32 %v609_v39, %v582_v61 }
 0x106   : > { %573 = vst.msk [vmem:[#allocation2 + $0x20] sm:$0xff] %vm403_vm1, %v564_v55  ;;  %v565_v60 = vadd.f32 %v548_v58, %v438_v53  ;;  %v583_v62 = vld [vmem:[#allocation2 + $0x18] sm:$0xff]  ;;  %v636_v2 = vmul.f32 %v599_v44, %v580_v59 }
 0x107   : > { %576 = vst.msk [vmem:[#allocation2 + $0x38] sm:$0xff] %vm403_vm1, %v567_v57  ;;  %v581_v63 = vld [vmem:[#allocation2 + $0x8] sm:$0xff]  ;;  %v639_v0 = vmul.f32 %v614_v48, %v583_v62 }
 0x108   : > { %574 = vst.msk [vmem:[#allocation2 + $0x28] sm:$0xff] %vm403_vm1, %v565_v60  ;;  %v637_v3 = vmul.f32 %v604_v54, %v581_v63 }
 0x109   : > { %v645_v7 = vpack.c.bf16 %v639_v0, %v638_v4 }
 0x10a   : > { %v644_v6 = vpack.c.bf16 %v637_v3, %v636_v2 }
 0x10c   : > { %1238 = vmatprep.mubr.msk.bf16.mxu1 %vm403_vm1, %v644_v6  ;;  %v586_v9 = vld [vmem:[#allocation2 + $0x30] sm:$0xff] }
 0x10d   : > { %1239 = vmatmul.mubr.msk.bf16.vlgmr.msra.gmra.mrb[0].mxu1 %vm403_vm1, %v645_v7  ;;  %v584_v8 = vld [vmem:[#allocation2 + $0x20] sm:$0xff]  ;;  %v642_v17 = vmul.f32 %v629_v14, %v586_v9 }
 0x10e   : > { %1247 = vmatpush3.bf16.msra.mxu1 %v1314_v31  ;;  %v587_v11 = vld [vmem:[#allocation2 + $0x38] sm:$0xff]  ;;  %v640_v15 = vmul.f32 %v619_v5, %v584_v8 }
 0x10f   : > { %v585_v12 = vld [vmem:[#allocation2 + $0x28] sm:$0xff]  ;;  %v643_v13 = vmul.f32 %v634_v10, %v587_v11 }
 0x110   : > { %v641_v16 = vmul.f32 %v624_v1, %v585_v12 }
 0x111   : > { %v647_v20 = vpack.c.bf16 %v643_v13, %v642_v17 }
 0x112   : > { %v646_v18 = vpack.c.bf16 %v641_v16, %v640_v15 }
 0x114   : > { %1242 = vmatprep.mubr.msk.bf16.mxu1 %vm403_vm1, %v646_v18 }
 0x115   : > { %1243 = vmatmul.mubr.msk.bf16.gmra.mrb[4].mxu1 %vm403_vm1, %v647_v20 }
 0x116   : > { %1248 = vmatprep.mubr.msk.bf16.mxu1 %vm403_vm1, %v1315_v19 }
 0x11d   : > { %1249 = vmatmul.mubr.msk.bf16.vlgmr.msra.gmra.mrb[0].mxu1 %vm403_vm1, %v1316_v21 }
 0x11e   : > { %1252 = vmatprep.mubr.msk.bf16.mxu1 %vm403_vm1, %v1317_v22 }
 0x125   : > { %1253 = vmatmul.mubr.msk.bf16.gmra.mrb[4].mxu1 %vm403_vm1, %v1318_v23 }
 0x1f0   : > { %v1250_v24 = vpop.f32.mrb[0].mxu1 }
 0x1f1   : > { %v1169_v25 = vpack.c.bf16 %v1250_v24, %v1250_v24  ;;  %v926_v26 = vpop.f32.mrb[1].mxu1 }
 0x1f2   : > { %v1167_v27 = vpack.c.bf16 %v926_v26, %v926_v26  ;;  %v1251_v28 = vpop.f32.mrb[2].mxu1 }
 0x1f3   : > { %1000 = vst.msk [vmem:[%s396_s12 + $0x8] sm:$0xf] %vm997_vm3, %v1169_v25  ;;  %v1170_v29 = vpack.c.bf16 %v1251_v28, %v1251_v28  ;;  %v929_v30 = vpop.f32.mrb[3].mxu1 }
 0x1f4   : > { %998 = vst.msk [vmem:[%s396_s12] sm:$0xf] %vm997_vm3, %v1167_v27  ;;  %v1168_v31 = vpack.c.bf16 %v929_v30, %v929_v30 }
 0x1f5   : > { %1001 = vst.msk [vmem:[%s396_s12 + $0xc] sm:$0xf] %vm997_vm3, %v1170_v29 }
 0x1f6   : > { %999 = vst.msk [vmem:[%s396_s12 + $0x4] sm:$0xf] %vm997_vm3, %v1168_v31 }
 0x1f8   : > { %v1254_v32 = vpop.f32.mrb[4].mxu1 }
 0x1f9   : > { %v1173_v33 = vpack.c.bf16 %v1254_v32, %v1254_v32  ;;  %v942_v34 = vpop.f32.mrb[5].mxu1 }
 0x1fa   : > { %v1171_v35 = vpack.c.bf16 %v942_v34, %v942_v34  ;;  %v1255_v36 = vpop.f32.mrb[6].mxu1 }
 0x1fb   : > { %1004 = vst.msk [vmem:[%s396_s12 + $0x18] sm:$0xf] %vm997_vm3, %v1173_v33  ;;  %v1174_v37 = vpack.c.bf16 %v1255_v36, %v1255_v36  ;;  %v945_v38 = vpop.f32.mrb[7].mxu1 }
 0x1fc   : > { %1002 = vst.msk [vmem:[%s396_s12 + $0x10] sm:$0xf] %vm997_vm3, %v1171_v35  ;;  %v1172_v39 = vpack.c.bf16 %v945_v38, %v945_v38 }
 0x1fd   : > { %1005 = vst.msk [vmem:[%s396_s12 + $0x1c] sm:$0xf] %vm997_vm3, %v1174_v37 }
 0x1fe   : > { %1003 = vst.msk [vmem:[%s396_s12 + $0x14] sm:$0xf] %vm997_vm3, %v1172_v39 }
 0x1ff PF: > { %s18_s29 = sadd.s32 1, %s1341_s29   ;;  %s1541_s27 = smov %s1337_s28 }
 0x200   : > { %p15_p6 = scmp.ge.s32.totalorder %s18_s29, 4   ;;  %s1542_s28 = smov %s1544_s30 }
 0x202   :  { %17 = sbr.rel (!%p15_p6) target bundleno = 2 (0x2), region = 100 }

</bundles_post_ra>
